<compile_context>
chip_gen: v6e
topology: v6e:2x2x1
jax: 0.10.0
libtpu: 0.0.40
codegen_flags: <defaults>
</compile_context>

<pallas_src>
import jax
import jax.numpy as jnp
from jax.experimental import pallas as pl
from jax.experimental.pallas import tpu as pltpu

LN_EPS = 1e-5
HIDDEN = 64                       # fixed by the nn.Module (nn.Linear(_, 64))
_INV_H = 1.0 / HIDDEN
_LANES = 128


def _round_up(x, m):
    return ((x + m - 1) // m) * m


def _layernorm(h, gamma, beta):
    # Single-pass fused stats. Padded lanes (>= HIDDEN) are exactly zero, so
    # the sums only see the 64 valid features; divide by the true count.
    s1 = jnp.sum(h, axis=-1, keepdims=True)
    s2 = jnp.sum(h * h, axis=-1, keepdims=True)
    mu = s1 * _INV_H
    var = jnp.maximum(s2 * _INV_H - mu * mu, 0.0)
    inv = jax.lax.rsqrt(var + LN_EPS)
    # gamma/beta are zero on padded lanes -> normalized padded lanes stay 0.
    return (h - mu) * inv * gamma + beta


def actor_kernel(x_ref, w1_ref, w2_ref, w3_ref, vec_ref, o_ref):
    x = x_ref[...]                       # [bt, S_pad]
    vec = vec_ref[...]                   # [8, PACK_W]
    hp = w1_ref.shape[1]                 # padded hidden width (128)
    ap = o_ref.shape[1]                  # padded action width (>=128)

    b1, g1, be1 = vec[0:1, :hp], vec[1:2, :hp], vec[2:3, :hp]
    b2, g2, be2 = vec[3:4, :hp], vec[4:5, :hp], vec[5:6, :hp]
    b3, max_a = vec[6:7, :ap], vec[7:8, :ap]

    # l1 + relu + layernorm
    h = jnp.dot(x, w1_ref[...], preferred_element_type=jnp.float32)
    h = jnp.maximum(h + b1, 0.0)
    h = _layernorm(h, g1, be1)

    # l2 + relu + layernorm
    h = jnp.dot(h, w2_ref[...], preferred_element_type=jnp.float32)
    h = jnp.maximum(h + b2, 0.0)
    h = _layernorm(h, g2, be2)

    # l3 + tanh, scale by max_action (lane-dense, padded lanes come out 0)
    a = jnp.dot(h, w3_ref[...], preferred_element_type=jnp.float32)
    o_ref[...] = max_a * jnp.tanh(a + b3)


def pack_actor_params(p):
    """One-time packing / zero-padding of raw params for the kernel."""
    state_dim = p["w1"].shape[0]
    action_dim = p["w3"].shape[1]
    sp = _round_up(state_dim, _LANES)
    hp = _round_up(HIDDEN, _LANES)          # 128
    ap = _round_up(action_dim, _LANES)
    pw = max(hp, ap)

    def pad2(w, r, c):
        return jnp.zeros((r, c), jnp.float32).at[:w.shape[0], :w.shape[1]].set(w)

    vec = jnp.zeros((8, pw), jnp.float32)
    vec = vec.at[0, :HIDDEN].set(p["b1"].reshape(-1))
    vec = vec.at[1, :HIDDEN].set(p["g1"].reshape(-1))
    vec = vec.at[2, :HIDDEN].set(p["be1"].reshape(-1))
    vec = vec.at[3, :HIDDEN].set(p["b2"].reshape(-1))
    vec = vec.at[4, :HIDDEN].set(p["g2"].reshape(-1))
    vec = vec.at[5, :HIDDEN].set(p["be2"].reshape(-1))
    vec = vec.at[6, :action_dim].set(p["b3"].reshape(-1))
    vec = vec.at[7, :action_dim].set(p["max_action"].reshape(-1))

    return dict(
        w1=pad2(p["w1"], sp, hp),
        w2=pad2(p["w2"], hp, hp),
        w3=pad2(p["w3"], hp, ap),
        vec=vec,
        state_dim=state_dim,
        action_dim=action_dim,
    )


def actor_forward(x, packed, *, block_b=256):
    """x: [B, state_dim] f32.  packed: output of pack_actor_params."""
    B, S = x.shape
    sp, hp = packed["w1"].shape
    ap = packed["w3"].shape[1]
    pw = packed["vec"].shape[1]
    action_dim = packed["action_dim"]

    # Batch tile: multiple of 8 sublanes, capped so (x + out) x 2 buffers stay
    # tiny relative to scoped VMEM on every generation (incl. v7x 64 MiB).
    bt = min(block_b, _round_up(B, 8))
    bp = _round_up(B, bt)

    # Zero-pad x to [B_pad, S_pad] (lane-dense, full tiles).
    xp = jnp.zeros((bp, sp), jnp.float32).at[:B, :S].set(x)

    out = pl.pallas_call(
        actor_kernel,
        out_shape=jax.ShapeDtypeStruct((bp, ap), jnp.float32),
        grid=(bp // bt,),
        in_specs=[
            pl.BlockSpec((bt, sp), lambda i: (i, 0)),   # x: tiled over rows
            pl.BlockSpec((sp, hp), lambda i: (0, 0)),   # w1: VMEM-resident
            pl.BlockSpec((hp, hp), lambda i: (0, 0)),   # w2: VMEM-resident
            pl.BlockSpec((hp, ap), lambda i: (0, 0)),   # w3: VMEM-resident
            pl.BlockSpec((8, pw), lambda i: (0, 0)),    # packed vectors
        ],
        out_specs=pl.BlockSpec((bt, ap), lambda i: (i, 0)),
        compiler_params=pltpu.CompilerParams(
            dimension_semantics=("parallel",)),
    )(xp, packed["w1"], packed["w2"], packed["w3"], packed["vec"])

    return out[:B, :action_dim]


def init_params(key, state_dim, action_dim, max_action):
    """Deterministic synthetic parameters matching the nn.Module shapes.

    Linear weights are stored transposed ([in, out]) relative to PyTorch's
    [out, in] so the kernel computes x @ W directly.
    """
    ks = jax.random.split(key, 6)

    def linear(kw, kb, fan_in, fan_out):
        bound = 1.0 / jnp.sqrt(fan_in)
        w = jax.random.uniform(kw, (fan_in, fan_out), jnp.float32, -bound, bound)
        b = jax.random.uniform(kb, (1, fan_out), jnp.float32, -bound, bound)
        return w, b

    w1, b1 = linear(ks[0], ks[1], state_dim, HIDDEN)
    w2, b2 = linear(ks[2], ks[3], HIDDEN, HIDDEN)
    w3, b3 = linear(ks[4], ks[5], HIDDEN, action_dim)

    return dict(
        w1=w1, b1=b1,
        g1=jnp.ones((1, HIDDEN), jnp.float32),
        be1=jnp.zeros((1, HIDDEN), jnp.float32),
        w2=w2, b2=b2,
        g2=jnp.ones((1, HIDDEN), jnp.float32),
        be2=jnp.zeros((1, HIDDEN), jnp.float32),
        w3=w3, b3=b3,
        max_action=jnp.full((1, action_dim), float(max_action), jnp.float32),
    )


def actor_forward_ref(x, p):
    """Pure-JAX reference (two-pass LayerNorm, unpadded) for correctness."""
    def ln(h, g, b):
        mu = jnp.mean(h, axis=-1, keepdims=True)
        var = jnp.mean((h - mu) ** 2, axis=-1, keepdims=True)
        return (h - mu) * jax.lax.rsqrt(var + LN_EPS) * g + b

    h = jnp.maximum(x @ p["w1"] + p["b1"], 0.0)
    h = ln(h, p["g1"], p["be1"])
    h = jnp.maximum(h @ p["w2"] + p["b2"], 0.0)
    h = ln(h, p["g2"], p["be2"])
    return p["max_action"] * jnp.tanh(h @ p["w3"] + p["b3"])


if __name__ == "__main__":
    key = jax.random.PRNGKey(0)
    k_params, k_x = jax.random.split(key)

    batch, state_dim, action_dim, max_action = 8, 16, 8, 2.0
    params = init_params(k_params, state_dim, action_dim, max_action)
    packed = pack_actor_params(params)
    x = jax.random.normal(k_x, (batch, state_dim), jnp.float32)

    out = jax.block_until_ready(actor_forward(x, packed))
    ref = actor_forward_ref(x, params)

    assert out.shape == (batch, action_dim)
    assert jnp.allclose(out, ref, atol=1e-4, rtol=1e-4), "mismatch vs reference"
    print("KERNEL_OK")
</pallas_src>

<mosaic_0001>
module attributes {stable_mosaic.version = 11 : i64} {
  func.func @actor_kernel(%arg0: i32, %arg1: memref<8x128xf32, #tpu.memory_space<vmem>>, %arg2: memref<128x128xf32, #tpu.memory_space<vmem>>, %arg3: memref<128x128xf32, #tpu.memory_space<vmem>>, %arg4: memref<128x128xf32, #tpu.memory_space<vmem>>, %arg5: memref<8x128xf32, #tpu.memory_space<vmem>>, %arg6: memref<8x128xf32, #tpu.memory_space<vmem>>) attributes {dimension_semantics = [#tpu.dimension_semantics<parallel>], iteration_bounds = array<i64: 1>, scalar_prefetch = 0 : i64, scratch_operands = 0 : i64, tpu.core_type = #tpu.core_type<tc>, window_params = [{transform_indices = @transform_0, window_bounds = array<i64: 8, 128>}, {pipeline_mode = #tpu.pipeline_mode<synchronous>, transform_indices = @transform_1, window_bounds = array<i64: 128, 128>}, {pipeline_mode = #tpu.pipeline_mode<synchronous>, transform_indices = @transform_2, window_bounds = array<i64: 128, 128>}, {pipeline_mode = #tpu.pipeline_mode<synchronous>, transform_indices = @transform_3, window_bounds = array<i64: 128, 128>}, {pipeline_mode = #tpu.pipeline_mode<synchronous>, transform_indices = @transform_4, window_bounds = array<i64: 8, 128>}, {transform_indices = @transform_5, window_bounds = array<i64: 8, 128>}]} {
    %c0 = arith.constant 0 : index
    %c0_0 = arith.constant 0 : index
    %0 = vector.load %arg1[%c0, %c0_0] : memref<8x128xf32, #tpu.memory_space<vmem>>, vector<8x128xf32>
    %c0_1 = arith.constant 0 : index
    %c0_2 = arith.constant 0 : index
    %1 = vector.load %arg5[%c0_1, %c0_2] : memref<8x128xf32, #tpu.memory_space<vmem>>, vector<8x128xf32>
    %2 = vector.extract_strided_slice %1 {offsets = [0, 0], sizes = [1, 128], strides = [1, 1]} : vector<8x128xf32> to vector<1x128xf32>
    %3 = vector.extract_strided_slice %1 {offsets = [1, 0], sizes = [1, 128], strides = [1, 1]} : vector<8x128xf32> to vector<1x128xf32>
    %4 = vector.extract_strided_slice %1 {offsets = [2, 0], sizes = [1, 128], strides = [1, 1]} : vector<8x128xf32> to vector<1x128xf32>
    %5 = vector.extract_strided_slice %1 {offsets = [3, 0], sizes = [1, 128], strides = [1, 1]} : vector<8x128xf32> to vector<1x128xf32>
    %6 = vector.extract_strided_slice %1 {offsets = [4, 0], sizes = [1, 128], strides = [1, 1]} : vector<8x128xf32> to vector<1x128xf32>
    %7 = vector.extract_strided_slice %1 {offsets = [5, 0], sizes = [1, 128], strides = [1, 1]} : vector<8x128xf32> to vector<1x128xf32>
    %8 = vector.extract_strided_slice %1 {offsets = [6, 0], sizes = [1, 128], strides = [1, 1]} : vector<8x128xf32> to vector<1x128xf32>
    %9 = vector.extract_strided_slice %1 {offsets = [7, 0], sizes = [1, 128], strides = [1, 1]} : vector<8x128xf32> to vector<1x128xf32>
    %c0_3 = arith.constant 0 : index
    %c0_4 = arith.constant 0 : index
    %10 = vector.load %arg2[%c0_3, %c0_4] : memref<128x128xf32, #tpu.memory_space<vmem>>, vector<128x128xf32>
    %cst = arith.constant dense<0.000000e+00> : vector<8x128xf32>
    %11 = tpu.matmul %0, %10, %cst {dimension_numbers = #tpu.dot_dimension_numbers<[1], [0], [0], [1], [0, 0, 1, 1], [], []>} : vector<8x128xf32>, vector<128x128xf32>, vector<8x128xf32> -> vector<8x128xf32>
    %12 = vector.broadcast %2 : vector<1x128xf32> to vector<8x128xf32>
    %13 = arith.addf %11, %12 : vector<8x128xf32>
    %cst_5 = arith.constant 0.000000e+00 : f32
    %14 = vector.broadcast %cst_5 : f32 to vector<8x128xf32>
    %15 = arith.maximumf %13, %14 : vector<8x128xf32>
    %cst_6 = arith.constant dense<0.000000e+00> : vector<8xf32>
    %16 = vector.multi_reduction <add>, %15, %cst_6 [1] : vector<8x128xf32> to vector<8xf32>
    %17 = vector.shape_cast %16 : vector<8xf32> to vector<8x1xf32>
    %18 = arith.mulf %15, %15 : vector<8x128xf32>
    %cst_7 = arith.constant dense<0.000000e+00> : vector<8xf32>
    %19 = vector.multi_reduction <add>, %18, %cst_7 [1] : vector<8x128xf32> to vector<8xf32>
    %20 = vector.shape_cast %19 : vector<8xf32> to vector<8x1xf32>
    %cst_8 = arith.constant 1.562500e-02 : f32
    %21 = vector.broadcast %cst_8 : f32 to vector<8x1xf32>
    %22 = arith.mulf %17, %21 : vector<8x1xf32>
    %cst_9 = arith.constant 1.562500e-02 : f32
    %23 = vector.broadcast %cst_9 : f32 to vector<8x1xf32>
    %24 = arith.mulf %20, %23 : vector<8x1xf32>
    %25 = arith.mulf %22, %22 : vector<8x1xf32>
    %26 = arith.subf %24, %25 : vector<8x1xf32>
    %cst_10 = arith.constant 0.000000e+00 : f32
    %27 = vector.broadcast %cst_10 : f32 to vector<8x1xf32>
    %28 = arith.maximumf %26, %27 : vector<8x1xf32>
    %cst_11 = arith.constant 9.99999974E-6 : f32
    %29 = vector.broadcast %cst_11 : f32 to vector<8x1xf32>
    %30 = arith.addf %28, %29 : vector<8x1xf32>
    %31 = math.rsqrt %30 : vector<8x1xf32>
    %32 = vector.broadcast %22 : vector<8x1xf32> to vector<8x128xf32>
    %33 = arith.subf %15, %32 : vector<8x128xf32>
    %34 = vector.broadcast %31 : vector<8x1xf32> to vector<8x128xf32>
    %35 = arith.mulf %33, %34 : vector<8x128xf32>
    %36 = vector.broadcast %3 : vector<1x128xf32> to vector<8x128xf32>
    %37 = arith.mulf %35, %36 : vector<8x128xf32>
    %38 = vector.broadcast %4 : vector<1x128xf32> to vector<8x128xf32>
    %39 = arith.addf %37, %38 : vector<8x128xf32>
    %c0_12 = arith.constant 0 : index
    %c0_13 = arith.constant 0 : index
    %40 = vector.load %arg3[%c0_12, %c0_13] : memref<128x128xf32, #tpu.memory_space<vmem>>, vector<128x128xf32>
    %cst_14 = arith.constant dense<0.000000e+00> : vector<8x128xf32>
    %41 = tpu.matmul %39, %40, %cst_14 {dimension_numbers = #tpu.dot_dimension_numbers<[1], [0], [0], [1], [0, 0, 1, 1], [], []>} : vector<8x128xf32>, vector<128x128xf32>, vector<8x128xf32> -> vector<8x128xf32>
    %42 = vector.broadcast %5 : vector<1x128xf32> to vector<8x128xf32>
    %43 = arith.addf %41, %42 : vector<8x128xf32>
    %cst_15 = arith.constant 0.000000e+00 : f32
    %44 = vector.broadcast %cst_15 : f32 to vector<8x128xf32>
    %45 = arith.maximumf %43, %44 : vector<8x128xf32>
    %cst_16 = arith.constant dense<0.000000e+00> : vector<8xf32>
    %46 = vector.multi_reduction <add>, %45, %cst_16 [1] : vector<8x128xf32> to vector<8xf32>
    %47 = vector.shape_cast %46 : vector<8xf32> to vector<8x1xf32>
    %48 = arith.mulf %45, %45 : vector<8x128xf32>
    %cst_17 = arith.constant dense<0.000000e+00> : vector<8xf32>
    %49 = vector.multi_reduction <add>, %48, %cst_17 [1] : vector<8x128xf32> to vector<8xf32>
    %50 = vector.shape_cast %49 : vector<8xf32> to vector<8x1xf32>
    %cst_18 = arith.constant 1.562500e-02 : f32
    %51 = vector.broadcast %cst_18 : f32 to vector<8x1xf32>
    %52 = arith.mulf %47, %51 : vector<8x1xf32>
    %cst_19 = arith.constant 1.562500e-02 : f32
    %53 = vector.broadcast %cst_19 : f32 to vector<8x1xf32>
    %54 = arith.mulf %50, %53 : vector<8x1xf32>
    %55 = arith.mulf %52, %52 : vector<8x1xf32>
    %56 = arith.subf %54, %55 : vector<8x1xf32>
    %cst_20 = arith.constant 0.000000e+00 : f32
    %57 = vector.broadcast %cst_20 : f32 to vector<8x1xf32>
    %58 = arith.maximumf %56, %57 : vector<8x1xf32>
    %cst_21 = arith.constant 9.99999974E-6 : f32
    %59 = vector.broadcast %cst_21 : f32 to vector<8x1xf32>
    %60 = arith.addf %58, %59 : vector<8x1xf32>
    %61 = math.rsqrt %60 : vector<8x1xf32>
    %62 = vector.broadcast %52 : vector<8x1xf32> to vector<8x128xf32>
    %63 = arith.subf %45, %62 : vector<8x128xf32>
    %64 = vector.broadcast %61 : vector<8x1xf32> to vector<8x128xf32>
    %65 = arith.mulf %63, %64 : vector<8x128xf32>
    %66 = vector.broadcast %6 : vector<1x128xf32> to vector<8x128xf32>
    %67 = arith.mulf %65, %66 : vector<8x128xf32>
    %68 = vector.broadcast %7 : vector<1x128xf32> to vector<8x128xf32>
    %69 = arith.addf %67, %68 : vector<8x128xf32>
    %c0_22 = arith.constant 0 : index
    %c0_23 = arith.constant 0 : index
    %70 = vector.load %arg4[%c0_22, %c0_23] : memref<128x128xf32, #tpu.memory_space<vmem>>, vector<128x128xf32>
    %cst_24 = arith.constant dense<0.000000e+00> : vector<8x128xf32>
    %71 = tpu.matmul %69, %70, %cst_24 {dimension_numbers = #tpu.dot_dimension_numbers<[1], [0], [0], [1], [0, 0, 1, 1], [], []>} : vector<8x128xf32>, vector<128x128xf32>, vector<8x128xf32> -> vector<8x128xf32>
    %72 = vector.broadcast %8 : vector<1x128xf32> to vector<8x128xf32>
    %73 = arith.addf %71, %72 : vector<8x128xf32>
    %74 = math.tanh %73 : vector<8x128xf32>
    %75 = vector.broadcast %9 : vector<1x128xf32> to vector<8x128xf32>
    %76 = arith.mulf %75, %74 : vector<8x128xf32>
    %c0_25 = arith.constant 0 : index
    %c0_26 = arith.constant 0 : index
    %77 = vector.load %arg6[%c0_25, %c0_26] : memref<8x128xf32, #tpu.memory_space<vmem>>, vector<8x128xf32>
    tpu.vector_store %arg6[%c0_25, %c0_26], %76 {strides = array<i32>} : memref<8x128xf32, #tpu.memory_space<vmem>>, vector<8x128xf32>,
    return
  }
  func.func @transform_0(%arg0: i32) -> (i32, i32) {
    %c0_i32 = arith.constant 0 : i32
    %c0_i32_0 = arith.constant 0 : i32
    return %arg0, %c0_i32 : i32, i32
  }
  func.func @transform_1(%arg0: i32) -> (i32, i32) {
    %c0_i32 = arith.constant 0 : i32
    %c0_i32_0 = arith.constant 0 : i32
    %c0_i32_1 = arith.constant 0 : i32
    return %c0_i32, %c0_i32_0 : i32, i32
  }
  func.func @transform_2(%arg0: i32) -> (i32, i32) {
    %c0_i32 = arith.constant 0 : i32
    %c0_i32_0 = arith.constant 0 : i32
    %c0_i32_1 = arith.constant 0 : i32
    return %c0_i32, %c0_i32_0 : i32, i32
  }
  func.func @transform_3(%arg0: i32) -> (i32, i32) {
    %c0_i32 = arith.constant 0 : i32
    %c0_i32_0 = arith.constant 0 : i32
    %c0_i32_1 = arith.constant 0 : i32
    return %c0_i32, %c0_i32_0 : i32, i32
  }
  func.func @transform_4(%arg0: i32) -> (i32, i32) {
    %c0_i32 = arith.constant 0 : i32
    %c0_i32_0 = arith.constant 0 : i32
    %c0_i32_1 = arith.constant 0 : i32
    return %c0_i32, %c0_i32_0 : i32, i32
  }
  func.func @transform_5(%arg0: i32) -> (i32, i32) {
    %c0_i32 = arith.constant 0 : i32
    %c0_i32_0 = arith.constant 0 : i32
    return %arg0, %c0_i32 : i32, i32
  }
}

</mosaic_0001>

<bundles_post_ra>
// kernel: tpu_custom_call.1
= control target key start
LH: loop header
LB: loop body
LE: loop exit
PB: predicated region body
PF: predicated region fallthrough
CT: control target
= control target key end

     0   :  { %10 = vsyncpa [#allocation3], 0  ;;  %s884_s0 = inlined_call_operand.hbm [shape: f32[8,128], index: 0, kind: input, shape index: {}]   ;;  %s885_s1 = inlined_call_operand.hbm [shape: f32[128,128], index: 1, kind: input, shape index: {}]   ;;  %s886_s2 = inlined_call_operand.hbm [shape: f32[128,128], index: 2, kind: input, shape index: {}]   ;;  %s887_s3 = inlined_call_operand.hbm [shape: f32[128,128], index: 3, kind: input, shape index: {}]   ;;  %s888_s4 = inlined_call_operand.hbm [shape: f32[8,128], index: 4, kind: input, shape index: {}]   ;;  %s889_s5 = inlined_call_operand.hbm [shape: f32[8,128], index: 5, kind: output, shape index: {}]  }
   0x1   :  { %11 = vsyncpa [#allocation6], 0 }
   0x2   :  { %12 = vsyncpa [#allocation9], 0 }
   0x3   :  { %13 = vsyncpa [#allocation4], 0  ;;  %s731_s18 = smov [#allocation5]  }
   0x4   :  { %s29_s19 = sshll.u32 %s731_s18, 4  ;;  %s30_s19 = int_to_ptr.vmem [resolvable:$true] %s29_s19 }
   0x5   :  { %s611_s20 = scalar_lea.vmem %s30_s19, 2048  ;;  %p616_p1 = scmp.lt.s32.totalorder %s30_s19, %s30_s19 }
   0x6   :  { %p612_p0 = scmp.ne.s32.totalorder %s30_s19, %s611_s20  ;;  %p617_p2 = scmp.lt.s32.totalorder %s611_s20, %s611_s20 }
   0x8   :  { %p618_p3 = por %p617_p2, %p616_p1 }
   0xa   :  { %p619_p4 = pnand %p618_p3, %p612_p0 }
   0xc   :  { %622 = shalt.err (!%p619_p4)
}
   0xd   :  { %s732_s21 = smov 128   ;;  %s733_s22 = smov 8  }
   0xe   :  { %35 = dma.hbm_to_vmem [thread:$0]  %s885_s1, 2048, %s30_s19, [#allocation6], %s732_s21, %s732_s21, %s733_s22  }
   0xf   :  { %s734_s25 = smov [#allocation8]   ;;  %s735_s27 = smov [#allocation2]  }
  0x10   :  { %s53_s26 = sshll.u32 %s734_s25, 4  ;;  %s20_s28 = sshll.u32 %s735_s27, 4  ;;  %s54_s26 = int_to_ptr.vmem [resolvable:$true] %s53_s26  ;;  %s21_s28 = int_to_ptr.vmem [resolvable:$true] %s20_s28 }
  0x11   :  { %s631_s29 = scalar_lea.vmem %s54_s26, 2048  ;;  %p636_p6 = scmp.lt.s32.totalorder %s54_s26, %s54_s26 }
  0x12   :  { %p632_p5 = scmp.ne.s32.totalorder %s54_s26, %s631_s29  ;;  %p637_p7 = scmp.lt.s32.totalorder %s631_s29, %s631_s29 }
  0x14   :  { %p638_p8 = por %p637_p7, %p636_p6 }
  0x16   :  { %p639_p9 = pnand %p638_p8, %p632_p5 }
  0x18   :  { %642 = shalt.err (!%p639_p9)
}
  0x19   :  { %59 = dma.hbm_to_vmem [thread:$0]  %s887_s3, 2048, %s54_s26, [#allocation9], %s732_s21, %s732_s21, %s733_s22  }
  0x1a   :  { %s651_s1 = scalar_lea.vmem %s21_s28, 128  ;;  %p656_p11 = scmp.lt.s32.totalorder %s21_s28, %s21_s28 }
  0x1b   :  { %p652_p10 = scmp.ne.s32.totalorder %s21_s28, %s651_s1  ;;  %p657_p12 = scmp.lt.s32.totalorder %s651_s1, %s651_s1 }
  0x1d   :  { %p658_p13 = por %p657_p12, %p656_p11 }
  0x1f   :  { %p659_p0 = pnand %p658_p13, %p652_p10 }
  0x21   :  { %662 = shalt.err (!%p659_p0)
}
  0x22   :  { %23 = dma.hbm_to_vmem [thread:$0]  %s884_s0, 128, %s21_s28, [#allocation3]  }
  0x23   :  { %s736_s9 = smov [#allocation7]   ;;  %s737_s11 = smov [#allocation10]  }
  0x24   :  { %s41_s10 = sshll.u32 %s736_s9, 4  ;;  %s66_s12 = sshll.u32 %s737_s11, 4  ;;  %s42_s10 = int_to_ptr.vmem [resolvable:$true] %s41_s10  ;;  %s67_s12 = int_to_ptr.vmem [resolvable:$true] %s66_s12 }
  0x25   :  { %s671_s13 = scalar_lea.vmem %s42_s10, 2048  ;;  %p676_p2 = scmp.lt.s32.totalorder %s42_s10, %s42_s10 }
  0x26   :  { %p672_p1 = scmp.ne.s32.totalorder %s42_s10, %s671_s13  ;;  %p677_p3 = scmp.lt.s32.totalorder %s671_s13, %s671_s13 }
  0x28   :  { %p678_p4 = por %p677_p3, %p676_p2 }
  0x2a   :  { %p679_p5 = pnand %p678_p4, %p672_p1 }
  0x2c   :  { %682 = shalt.err (!%p679_p5)
}
  0x2d   :  { %47 = dma.hbm_to_vmem [thread:$0]  %s886_s2, 2048, %s42_s10, [#allocation6], %s732_s21, %s732_s21, %s733_s22  }
  0x2e   :  { %s691_s0 = scalar_lea.vmem %s67_s12, 128  ;;  %p696_p7 = scmp.lt.s32.totalorder %s67_s12, %s67_s12 }
  0x2f   :  { %p692_p6 = scmp.ne.s32.totalorder %s67_s12, %s691_s0  ;;  %p697_p8 = scmp.lt.s32.totalorder %s691_s0, %s691_s0 }
  0x31   :  { %p698_p9 = por %p697_p8, %p696_p7 }
  0x33   :  { %p699_p10 = pnand %p698_p9, %p692_p6 }
  0x35   :  { %702 = shalt.err (!%p699_p10)
}
  0x36   :  { %69 = dma.hbm_to_vmem [thread:$0]  %s888_s4, 128, %s67_s12, [#allocation9]  }
  0x37   :  { %723 = dma.done.wait [#allocation3], 128  }
  0x38   :  { %724 = vsyncadd [#allocation3], 4294967168 }
  0x39   :  { %725 = dma.done.wait [#allocation6], 4096  }
  0x3a   :  { %726 = vsyncadd [#allocation6], 4294963200 }
  0x3b   :  { %727 = dma.done.wait [#allocation9], 2176  }
  0x3c   :  { %728 = vsyncadd [#allocation9], 4294965120  ;;  %v738_v0 = vmov 0.0   ;;  %vm739_vm0 = vmmov 0   ;;  %v102_v1 = vld [vmem:[#allocation5 + $0x78] sm:$0xff]  ;;  %v101_v2 = vld [vmem:[#allocation5 + $0x70] sm:$0xff]  ;;  %v103_v18 = vlaneseq }
  0x3d   :  { %482 = vmatprep.subr.mxu0 %v738_v0  ;;  %514 = vmatprep.mubr.msk.f32.mxu0 %vm739_vm0, %v738_v0  ;;  %v100_v3 = vld [vmem:[#allocation5 + $0x68] sm:$0xff]  ;;  %v99_v4 = vld [vmem:[#allocation5 + $0x60] sm:$0xff]  ;;  %v98_v5 = vld [vmem:[#allocation5 + $0x58] sm:$0xff]  ;;  %s740_s2 = smov [#allocation11]  }
  0x3e   :  { %517 = vmatprep.subr.mxu1 %v738_v0  ;;  %549 = vmatprep.mubr.msk.f32.mxu1 %vm739_vm0, %v738_v0  ;;  %v97_v6 = vld [vmem:[#allocation5 + $0x50] sm:$0xff]  ;;  %v96_v7 = vld [vmem:[#allocation5 + $0x48] sm:$0xff]  ;;  %v95_v8 = vld [vmem:[#allocation5 + $0x40] sm:$0xff]  ;;  %v819_v19 = vshrl.u32 %v103_v18, 7  ;;  %s420_s4 = sshll.u32 %s740_s2, 4  ;;  %s421_s4 = int_to_ptr.vmem [resolvable:$true] %s420_s4 }
  0x3f   :  { %483 = vmatpush3.msra.mxu0 %v102_v1  ;;  %v94_v9 = vld [vmem:[#allocation5 + $0x38] sm:$0xff]  ;;  %v93_v10 = vld [vmem:[#allocation5 + $0x30] sm:$0xff]  ;;  %v92_v11 = vld [vmem:[#allocation5 + $0x28] sm:$0xff]  ;;  %s703_s17 = scalar_lea.vmem %s421_s4, 128  ;;  %p708_p12 = scmp.lt.s32.totalorder %s421_s4, %s421_s4 }
  0x40   :  { %484 = vmatprep.subr.mxu0 %v738_v0  ;;  %v91_v12 = vld [vmem:[#allocation5 + $0x20] sm:$0xff]  ;;  %v90_v13 = vld [vmem:[#allocation5 + $0x18] sm:$0xff]  ;;  %v89_v14 = vld [vmem:[#allocation5 + $0x10] sm:$0xff]  ;;  %v105_v20 = vsub.s32 0, %v819_v19  ;;  %v194_v52 = vsub.s32 1, %v819_v19  ;;  %v199_v53 = vsub.s32 2, %v819_v19  ;;  %p704_p11 = scmp.ne.s32.totalorder %s421_s4, %s703_s17  ;;  %p709_p13 = scmp.lt.s32.totalorder %s703_s17, %s703_s17 }
  0x41   :  { %485 = vmatpush3.msra.mxu0 %v101_v2  ;;  %v88_v15 = vld [vmem:[#allocation5 + $0x8] sm:$0xff]  ;;  %v87_v16 = vld [vmem:[#allocation5] sm:$0xff]  ;;  %v85_v17 = vld [vmem:[#allocation2] sm:$0xff]  ;;  %v220_v61 = vsub.s32 3, %v819_v19 }
  0x42   :  { %486 = vmatprep.subr.mxu0 %v738_v0  ;;  %v822_v21 = vld [vmem:[#allocation10] sm:$0xff]  ;;  %v217_v28 = vld [vmem:[#allocation7 + $0x78] sm:$0xff]  ;;  %v216_v29 = vld [vmem:[#allocation7 + $0x70] sm:$0xff]  ;;  %p710_p0 = por %p709_p13, %p708_p12 }
  0x43   :  { %487 = vmatpush3.msra.mxu0 %v100_v3  ;;  %v106_v22 = vrot.slane %v822_v21, %v105_v20  ;;  %518 = vmatpush3.msra.mxu1 %v217_v28  ;;  %v215_v30 = vld [vmem:[#allocation7 + $0x68] sm:$0xff]  ;;  %v214_v31 = vld [vmem:[#allocation7 + $0x60] sm:$0xff]  ;;  %v213_v32 = vld [vmem:[#allocation7 + $0x58] sm:$0xff]  ;;  %v195_v55 = vrot.slane %v822_v21, %v194_v52  ;;  %v200_v58 = vrot.slane %v822_v21, %v199_v53 }
  0x44   :  { %488 = vmatprep.subr.mxu0 %v738_v0  ;;  %519 = vmatprep.subr.mxu1 %v738_v0  ;;  %v212_v33 = vld [vmem:[#allocation7 + $0x50] sm:$0xff]  ;;  %v211_v34 = vld [vmem:[#allocation7 + $0x48] sm:$0xff]  ;;  %v210_v35 = vld [vmem:[#allocation7 + $0x40] sm:$0xff]  ;;  %v221_v62 = vrot.slane %v822_v21, %v220_v61  ;;  %p711_p1 = pnand %p710_p0, %p704_p11 }
  0x45   :  { %489 = vmatpush3.msra.mxu0 %v99_v4  ;;  %520 = vmatpush3.msra.mxu1 %v216_v29  ;;  %v209_v36 = vld [vmem:[#allocation7 + $0x38] sm:$0xff]  ;;  %v208_v37 = vld [vmem:[#allocation7 + $0x30] sm:$0xff]  ;;  %v207_v38 = vld [vmem:[#allocation7 + $0x28] sm:$0xff] }
  0x46   :  { %490 = vmatprep.subr.mxu0 %v738_v0  ;;  %521 = vmatprep.subr.mxu1 %v738_v0  ;;  %v206_v39 = vld [vmem:[#allocation7 + $0x20] sm:$0xff]  ;;  %v205_v40 = vld [vmem:[#allocation7 + $0x18] sm:$0xff]  ;;  %v204_v41 = vld [vmem:[#allocation7 + $0x10] sm:$0xff] }
  0x47   :  { %491 = vmatpush3.msra.mxu0 %v98_v5  ;;  %522 = vmatpush3.msra.mxu1 %v215_v30  ;;  %v203_v42 = vld [vmem:[#allocation7 + $0x8] sm:$0xff]  ;;  %v202_v43 = vld [vmem:[#allocation7] sm:$0xff]  ;;  %v332_v5 = vld [vmem:[#allocation8 + $0x78] sm:$0xff] }
  0x48   :  { %492 = vmatprep.subr.mxu0 %v738_v0  ;;  %523 = vmatprep.subr.mxu1 %v738_v0  ;;  %v319_v18 = vld [vmem:[#allocation8 + $0x10] sm:$0xff]  ;;  %v318_v20 = vld [vmem:[#allocation8 + $0x8] sm:$0xff] }
  0x49   :  { %493 = vmatpush3.msra.mxu0 %v97_v6  ;;  %524 = vmatpush3.msra.mxu1 %v214_v31  ;;  %v331_v6 = vld [vmem:[#allocation8 + $0x70] sm:$0xff]  ;;  %v309_v31 = vsub.s32 4, %v819_v19 }
  0x4a   :  { %494 = vmatprep.subr.mxu0 %v738_v0  ;;  %525 = vmatprep.subr.mxu1 %v738_v0 }
  0x4b   :  { %495 = vmatpush3.msra.mxu0 %v96_v7  ;;  %526 = vmatpush3.msra.mxu1 %v213_v32  ;;  %v330_v7 = vld [vmem:[#allocation8 + $0x68] sm:$0xff]  ;;  %v314_v32 = vsub.s32 5, %v819_v19 }
  0x4c   :  { %496 = vmatprep.subr.mxu0 %v738_v0  ;;  %527 = vmatprep.subr.mxu1 %v738_v0 }
  0x4d   :  { %497 = vmatpush3.msra.mxu0 %v95_v8  ;;  %528 = vmatpush3.msra.mxu1 %v212_v33  ;;  %v329_v8 = vld [vmem:[#allocation8 + $0x60] sm:$0xff] }
  0x4e   :  { %498 = vmatprep.subr.mxu0 %v738_v0  ;;  %529 = vmatprep.subr.mxu1 %v738_v0 }
  0x4f   :  { %499 = vmatpush3.msra.mxu0 %v94_v9  ;;  %530 = vmatpush3.msra.mxu1 %v211_v34  ;;  %v328_v9 = vld [vmem:[#allocation8 + $0x58] sm:$0xff]  ;;  %v310_v34 = vrot.slane %v822_v21, %v309_v31 }
  0x50   :  { %500 = vmatprep.subr.mxu0 %v738_v0  ;;  %531 = vmatprep.subr.mxu1 %v738_v0 }
  0x51   :  { %501 = vmatpush3.msra.mxu0 %v93_v10  ;;  %532 = vmatpush3.msra.mxu1 %v210_v35  ;;  %v327_v10 = vld [vmem:[#allocation8 + $0x50] sm:$0xff] }
  0x52   :  { %502 = vmatprep.subr.mxu0 %v738_v0  ;;  %533 = vmatprep.subr.mxu1 %v738_v0 }
  0x53   :  { %503 = vmatpush3.msra.mxu0 %v92_v11  ;;  %534 = vmatpush3.msra.mxu1 %v209_v36  ;;  %v326_v11 = vld [vmem:[#allocation8 + $0x48] sm:$0xff]  ;;  %v315_v36 = vrot.slane %v822_v21, %v314_v32 }
  0x54   :  { %504 = vmatprep.subr.mxu0 %v738_v0  ;;  %535 = vmatprep.subr.mxu1 %v738_v0 }
  0x55   :  { %505 = vmatpush3.msra.mxu0 %v91_v12  ;;  %536 = vmatpush3.msra.mxu1 %v208_v37  ;;  %v325_v12 = vld [vmem:[#allocation8 + $0x40] sm:$0xff] }
  0x56   :  { %506 = vmatprep.subr.mxu0 %v738_v0  ;;  %537 = vmatprep.subr.mxu1 %v738_v0 }
  0x57   :  { %507 = vmatpush3.msra.mxu0 %v90_v13  ;;  %538 = vmatpush3.msra.mxu1 %v207_v38  ;;  %v324_v13 = vld [vmem:[#allocation8 + $0x38] sm:$0xff] }
  0x58   :  { %508 = vmatprep.subr.mxu0 %v738_v0  ;;  %539 = vmatprep.subr.mxu1 %v738_v0 }
  0x59   :  { %509 = vmatpush3.msra.mxu0 %v89_v14  ;;  %540 = vmatpush3.msra.mxu1 %v206_v39  ;;  %v323_v14 = vld [vmem:[#allocation8 + $0x30] sm:$0xff]  ;;  %v335_v39 = vsub.s32 6, %v819_v19 }
  0x5a   :  { %510 = vmatprep.subr.mxu0 %v738_v0  ;;  %541 = vmatprep.subr.mxu1 %v738_v0 }
  0x5b   :  { %511 = vmatpush3.msra.mxu0 %v88_v15  ;;  %542 = vmatpush3.msra.mxu1 %v205_v40  ;;  %v322_v15 = vld [vmem:[#allocation8 + $0x28] sm:$0xff]  ;;  %v336_v40 = vrot.slane %v822_v21, %v335_v39 }
  0x5c   :  { %512 = vmatprep.subr.mxu0 %v738_v0  ;;  %543 = vmatprep.subr.mxu1 %v738_v0 }
  0x5d   :  { %513 = vmatpush3.msra.mxu0 %v87_v16  ;;  %544 = vmatpush3.msra.mxu1 %v204_v41  ;;  %v321_v16 = vld [vmem:[#allocation8 + $0x20] sm:$0xff] }
  0x5e   :  { %515 = vmatmul.mubr.f32.vlgmr.msra.gmra.mxu0 %v85_v17  ;;  %552 = vmatprep.subr.mxu0 %v738_v0  ;;  %v320_v17 = vld [vmem:[#allocation8 + $0x18] sm:$0xff] }
  0x5f   :  { %584 = vmatprep.mubr.msk.f32.mxu0 %vm739_vm0, %v738_v0  ;;  %545 = vmatprep.subr.mxu1 %v738_v0 }
  0x60   :  { %546 = vmatpush3.msra.mxu1 %v203_v42  ;;  %553 = vmatpush3.msra.mxu0 %v332_v5 }
  0x61   :  { %547 = vmatprep.subr.mxu1 %v738_v0  ;;  %554 = vmatprep.subr.mxu0 %v738_v0 }
  0x62   :  { %548 = vmatpush3.msra.mxu1 %v202_v43  ;;  %555 = vmatpush3.msra.mxu0 %v331_v6 }
  0x63   :  { %556 = vmatprep.subr.mxu0 %v738_v0 }
  0x64   :  { %557 = vmatpush3.msra.mxu0 %v330_v7 }
  0x65   :  { %558 = vmatprep.subr.mxu0 %v738_v0 }
  0x66   :  { %559 = vmatpush3.msra.mxu0 %v329_v8 }
  0x67   :  { %560 = vmatprep.subr.mxu0 %v738_v0 }
  0x68   :  { %561 = vmatpush3.msra.mxu0 %v328_v9 }
  0x69   :  { %562 = vmatprep.subr.mxu0 %v738_v0 }
  0x6a   :  { %563 = vmatpush3.msra.mxu0 %v327_v10 }
  0x6b   :  { %564 = vmatprep.subr.mxu0 %v738_v0 }
  0x6c   :  { %565 = vmatpush3.msra.mxu0 %v326_v11 }
  0x6d   :  { %566 = vmatprep.subr.mxu0 %v738_v0 }
  0x6e   :  { %567 = vmatpush3.msra.mxu0 %v325_v12 }
  0x6f   :  { %568 = vmatprep.subr.mxu0 %v738_v0 }
  0x70   :  { %569 = vmatpush3.msra.mxu0 %v324_v13 }
  0x71   :  { %570 = vmatprep.subr.mxu0 %v738_v0 }
  0x72   :  { %571 = vmatpush3.msra.mxu0 %v323_v14 }
  0x73   :  { %572 = vmatprep.subr.mxu0 %v738_v0 }
  0x74   :  { %573 = vmatpush3.msra.mxu0 %v322_v15 }
  0x75   :  { %574 = vmatprep.subr.mxu0 %v738_v0 }
  0x76   :  { %575 = vmatpush3.msra.mxu0 %v321_v16 }
  0x77   :  { %576 = vmatprep.subr.mxu0 %v738_v0 }
  0x78   :  { %577 = vmatpush3.msra.mxu0 %v320_v17 }
  0x79   :  { %578 = vmatprep.subr.mxu0 %v738_v0 }
  0x7a   :  { %579 = vmatpush3.msra.mxu0 %v319_v18 }
  0x7b   :  { %580 = vmatprep.subr.mxu0 %v738_v0 }
  0x7c   :  { %581 = vmatpush3.msra.mxu0 %v318_v20 }
  0x7d   :  { %582 = vmatprep.subr.mxu0 %v738_v0 }
 0x11e   :  { %v173_v23 = vpop.f32.mrf.mxu0 }
 0x11f   :  { %v174_v24 = vadd.f32 %v173_v23, %v106_v22  ;;  %v317_v22 = vld [vmem:[#allocation8] sm:$0xff] }
 0x120   :  { %v516_v25 = vpop.f32.mrf.mxu0  ;;  %583 = vmatpush3.msra.mxu0 %v317_v22 }
 0x121   :  { %v825_v26 = vmax.f32 %v174_v24, 0.0 }
 0x123   :  { %178 = vadd.xlane.f32.xlu0 %v825_v26  ;;  %v180_v27 = vmul.f32 %v825_v26, %v825_v26 }
 0x127   :  { %181 = vadd.xlane.f32.xlu0 %v180_v27 }
 0x1ac   :  { %v179_v44 = vpop.xlane.xlu0 %178 }
 0x1ad   :  { %v183_v45 = vmul.f32 0.015625, %v179_v44  ;;  %v410_v44 = vsub.s32 7, %v819_v19 }
 0x1af   :  { %v185_v47 = vmul.f32 %v183_v45, %v183_v45  ;;  %v190_v54 = vsub.f32 %v825_v26, %v183_v45  ;;  %v411_v45 = vrot.slane %v822_v21, %v410_v44 }
 0x1b0   :  { %v182_v46 = vpop.xlane.xlu0 %181 }
 0x1b1   :  { %v184_v48 = vmul.f32 0.015625, %v182_v46 }
 0x1b3   :  { %v186_v49 = vsub.f32 %v184_v48, %v185_v47 }
 0x1b5   :  { %v187_v50 = vmax.f32 %v186_v49, 0.0 }
 0x1b7   :  { %v188_v51 = vadd.f32 1e-05, %v187_v50 }
 0x1b9   :  { %597 = vrsqrt.f32 %v188_v51 }
 0x1c6   :  { %v598_v56 = vpop.eup %597 }
 0x1c7   :  { %v191_v57 = vmul.f32 %v598_v56, %v190_v54 }
 0x1c9   :  { %v196_v59 = vmul.f32 %v195_v55, %v191_v57 }
 0x1cb   :  { %v201_v60 = vadd.f32 %v200_v58, %v196_v59 }
 0x1cd   :  { %550 = vmatmul.mubr.f32.vlgmr.msra.gmra.mxu1 %v201_v60 }
 0x28d   :  { %v288_v63 = vpop.f32.mrf.mxu1 }
 0x28e   :  { %v289_v1 = vadd.f32 %v288_v63, %v221_v62 }
 0x28f   :  { %v551_v2 = vpop.f32.mrf.mxu1 }
 0x290   :  { %v852_v3 = vmax.f32 %v289_v1, 0.0 }
 0x292   :  { %293 = vadd.xlane.f32.xlu1 %v852_v3  ;;  %v295_v4 = vmul.f32 %v852_v3, %v852_v3 }
 0x296   :  { %296 = vadd.xlane.f32.xlu1 %v295_v4 }
 0x31b   :  { %v294_v23 = vpop.xlane.xlu1 %293 }
 0x31c   :  { %v298_v24 = vmul.f32 0.015625, %v294_v23 }
 0x31e   :  { %v300_v26 = vmul.f32 %v298_v24, %v298_v24  ;;  %v305_v33 = vsub.f32 %v852_v3, %v298_v24 }
 0x31f   :  { %v297_v25 = vpop.xlane.xlu1 %296 }
 0x320   :  { %v299_v27 = vmul.f32 0.015625, %v297_v25 }
 0x322   :  { %v301_v28 = vsub.f32 %v299_v27, %v300_v26 }
 0x324   :  { %v302_v29 = vmax.f32 %v301_v28, 0.0 }
 0x326   :  { %v303_v30 = vadd.f32 1e-05, %v302_v29 }
 0x328   :  { %599 = vrsqrt.f32 %v303_v30 }
 0x335   :  { %v600_v35 = vpop.eup %599 }
 0x336   :  { %v306_v0 = vmul.f32 %v600_v35, %v305_v33 }
 0x338   :  { %v311_v37 = vmul.f32 %v310_v34, %v306_v0 }
 0x33a   :  { %v316_v38 = vadd.f32 %v315_v36, %v311_v37 }
 0x33c   :  { %585 = vmatmul.mubr.f32.vlgmr.msra.gmra.mxu0 %v316_v38 }
 0x3fc   :  { %v403_v41 = vpop.f32.mrf.mxu0 }
 0x3fd   :  { %v404_v42 = vadd.f32 %v403_v41, %v336_v40 }
 0x3fe   :  { %v586_v43 = vpop.f32.mrf.mxu0 }
 0x3ff   :  { %601 = vtanh.f32 %v404_v42 }
 0x40c   :  { %v602_v46 = vpop.eup %601 }
 0x40d   :  { %v412_v47 = vmul.f32 %v602_v46, %v411_v45 }
 0x40f   :  { %413 = vst [vmem:[#allocation11] sm:$0xff] %v412_v47 }
 0x410   :  { %714 = shalt.err (!%p711_p1)
}
 0x411   :  { %423 = dma.vmem_to_hbm [thread:$0]  %s421_s4, 128, %s889_s5, [#allocation4]  }
 0x412   :  { %729 = dma.done.wait [#allocation4], 128  }
 0x413   :  { %730 = vsyncadd [#allocation4], 4294967168 }
 0x414   :  { %427 = vsyncpa [#allocation3], 1 }
 0x415   :  { %428 = vsyncpa [#allocation6], 1 }
 0x416   :  { %429 = vsyncpa [#allocation9], 1 }
 0x417   :  { %430 = vsyncpa [#allocation4], 1 }

</bundles_post_ra>
